<compile_context>
chip_gen: v5e
topology: v5e:2x2
jax: 0.10.0
libtpu: 0.0.40
codegen_flags: <defaults>
</compile_context>

<pallas_src>
import jax
import jax.numpy as jnp
from jax.experimental import pallas as pl
from jax.experimental.pallas import tpu as pltpu

_LN_EPS = 1e-5  # PyTorch nn.LayerNorm default


def add_norm_kernel(x_ref, y_ref, gamma_ref, beta_ref, out_ref):
    # TODO(synk): training-mode dropout (inverted dropout mask via
    # pltpu.prng_seed / pltpu.stateful_bernoulli) is not implemented;
    # eval-mode dropout is the identity, which matches module.eval() forward.
    x = x_ref[...].astype(jnp.float32)           # [tR, H]
    y = y_ref[...].astype(jnp.float32)           # [tR, H]

    res = x + y                                   # residual add
    mean = jnp.mean(res, axis=-1, keepdims=True)
    centered = res - mean
    var = jnp.mean(centered * centered, axis=-1, keepdims=True)
    normed = centered * jax.lax.rsqrt(var + _LN_EPS)

    out_ref[...] = (normed * gamma_ref[...].astype(jnp.float32)
                    + beta_ref[...].astype(jnp.float32)).astype(out_ref.dtype)


def add_norm(x, y, gamma, beta, *, target_tile_bytes=2 * 1024 * 1024):
    """out = LayerNorm(y + x) over the last axis, with affine (gamma, beta).

    x, y: [..., H]; gamma, beta: [H].  Leading dims are flattened into a
    single row axis and tiled over a 1-D grid.
    """
    assert x.shape == y.shape, "x and y must have the same shape"
    orig_shape = x.shape
    H = orig_shape[-1]
    N = x.size // H

    x2 = x.reshape(N, H)
    y2 = y.reshape(N, H)
    gamma2 = gamma.reshape(1, H)
    beta2 = beta.reshape(1, H)

    # Adaptive row tile: ~target_tile_bytes per buffered block, a multiple of
    # 8 sublanes, clamped to the full row count (then block == full dim, which
    # is always legal).  With 3 row-tiled operands double-buffered this stays
    # well under the scoped VMEM limit on every generation (v7x: 64 MiB phys).
    bytes_per_row = H * x.dtype.itemsize
    tR = (target_tile_bytes // max(bytes_per_row, 1)) // 8 * 8
    tR = max(8, tR)
    if tR >= N:
        tR = N
    grid = (pl.cdiv(N, tR),)

    row_spec = pl.BlockSpec((tR, H), lambda i: (i, 0))
    vec_spec = pl.BlockSpec((1, H), lambda i: (0, 0))

    out = pl.pallas_call(
        add_norm_kernel,
        out_shape=jax.ShapeDtypeStruct((N, H), x.dtype),
        grid_spec=pltpu.PrefetchScalarGridSpec(
            num_scalar_prefetch=0,
            grid=grid,
            in_specs=[row_spec, row_spec, vec_spec, vec_spec],
            out_specs=row_spec,
        ),
        compiler_params=pltpu.CompilerParams(
            dimension_semantics=("parallel",)),
    )(x2, y2, gamma2, beta2)

    return out.reshape(orig_shape)


def add_norm_reference(x, y, gamma, beta):
    res = (x + y).astype(jnp.float32)
    mean = jnp.mean(res, axis=-1, keepdims=True)
    var = jnp.mean((res - mean) ** 2, axis=-1, keepdims=True)
    normed = (res - mean) * jax.lax.rsqrt(var + _LN_EPS)
    return (normed * gamma + beta).astype(x.dtype)


if __name__ == "__main__":
    # Small test shapes consistent with the module: [batch, seq, hidden].
    B, T, H = 2, 8, 32

    key = jax.random.PRNGKey(0)
    kx, ky, kg, kb = jax.random.split(key, 4)

    x = jax.random.normal(kx, (B, T, H), dtype=jnp.float32)
    y = jax.random.normal(ky, (B, T, H), dtype=jnp.float32)
    gamma = 1.0 + 0.1 * jax.random.normal(kg, (H,), dtype=jnp.float32)
    beta = 0.1 * jax.random.normal(kb, (H,), dtype=jnp.float32)

    out = add_norm(x, y, gamma, beta)
    out = jax.block_until_ready(out)

    ref = add_norm_reference(x, y, gamma, beta)
    assert out.shape == (B, T, H)
    assert jnp.allclose(out, ref, atol=1e-5, rtol=1e-5), "mismatch vs reference"

    print("KERNEL_OK")
</pallas_src>

<mosaic_0001>
module attributes {stable_mosaic.version = 11 : i64} {
  func.func @add_norm_kernel(%arg0: i32, %arg1: memref<16x32xf32, #tpu.memory_space<vmem>>, %arg2: memref<16x32xf32, #tpu.memory_space<vmem>>, %arg3: memref<1x32xf32, #tpu.memory_space<vmem>>, %arg4: memref<1x32xf32, #tpu.memory_space<vmem>>, %arg5: memref<16x32xf32, #tpu.memory_space<vmem>>) attributes {dimension_semantics = [#tpu.dimension_semantics<parallel>], iteration_bounds = array<i64: 1>, scalar_prefetch = 0 : i64, scratch_operands = 0 : i64, tpu.core_type = #tpu.core_type<tc>, window_params = [{transform_indices = @transform_0, window_bounds = array<i64: 16, 32>}, {transform_indices = @transform_1, window_bounds = array<i64: 16, 32>}, {pipeline_mode = #tpu.pipeline_mode<synchronous>, transform_indices = @transform_2, window_bounds = array<i64: 1, 32>}, {pipeline_mode = #tpu.pipeline_mode<synchronous>, transform_indices = @transform_3, window_bounds = array<i64: 1, 32>}, {transform_indices = @transform_4, window_bounds = array<i64: 16, 32>}]} {
    %c0 = arith.constant 0 : index
    %c0_0 = arith.constant 0 : index
    %0 = vector.load %arg1[%c0, %c0_0] : memref<16x32xf32, #tpu.memory_space<vmem>>, vector<16x32xf32>
    %c0_1 = arith.constant 0 : index
    %c0_2 = arith.constant 0 : index
    %1 = vector.load %arg2[%c0_1, %c0_2] : memref<16x32xf32, #tpu.memory_space<vmem>>, vector<16x32xf32>
    %2 = arith.addf %0, %1 : vector<16x32xf32>
    %cst = arith.constant dense<0.000000e+00> : vector<16xf32>
    %3 = vector.multi_reduction <add>, %2, %cst [1] : vector<16x32xf32> to vector<16xf32>
    %4 = vector.shape_cast %3 : vector<16xf32> to vector<16x1xf32>
    %cst_3 = arith.constant 3.200000e+01 : f32
    %5 = vector.broadcast %cst_3 : f32 to vector<16x1xf32>
    %6 = arith.divf %4, %5 : vector<16x1xf32>
    %7 = vector.broadcast %6 : vector<16x1xf32> to vector<16x32xf32>
    %8 = arith.subf %2, %7 : vector<16x32xf32>
    %9 = arith.mulf %8, %8 : vector<16x32xf32>
    %cst_4 = arith.constant dense<0.000000e+00> : vector<16xf32>
    %10 = vector.multi_reduction <add>, %9, %cst_4 [1] : vector<16x32xf32> to vector<16xf32>
    %11 = vector.shape_cast %10 : vector<16xf32> to vector<16x1xf32>
    %cst_5 = arith.constant 3.200000e+01 : f32
    %12 = vector.broadcast %cst_5 : f32 to vector<16x1xf32>
    %13 = arith.divf %11, %12 : vector<16x1xf32>
    %cst_6 = arith.constant 9.99999974E-6 : f32
    %14 = vector.broadcast %cst_6 : f32 to vector<16x1xf32>
    %15 = arith.addf %13, %14 : vector<16x1xf32>
    %16 = math.rsqrt %15 : vector<16x1xf32>
    %17 = vector.broadcast %16 : vector<16x1xf32> to vector<16x32xf32>
    %18 = arith.mulf %8, %17 : vector<16x32xf32>
    %c0_7 = arith.constant 0 : index
    %c0_8 = arith.constant 0 : index
    %19 = vector.load %arg3[%c0_7, %c0_8] : memref<1x32xf32, #tpu.memory_space<vmem>>, vector<1x32xf32>
    %20 = vector.broadcast %19 : vector<1x32xf32> to vector<16x32xf32>
    %21 = arith.mulf %18, %20 : vector<16x32xf32>
    %c0_9 = arith.constant 0 : index
    %c0_10 = arith.constant 0 : index
    %22 = vector.load %arg4[%c0_9, %c0_10] : memref<1x32xf32, #tpu.memory_space<vmem>>, vector<1x32xf32>
    %23 = vector.broadcast %22 : vector<1x32xf32> to vector<16x32xf32>
    %24 = arith.addf %21, %23 : vector<16x32xf32>
    %c0_11 = arith.constant 0 : index
    %c0_12 = arith.constant 0 : index
    %25 = vector.load %arg5[%c0_11, %c0_12] : memref<16x32xf32, #tpu.memory_space<vmem>>, vector<16x32xf32>
    tpu.vector_store %arg5[%c0_11, %c0_12], %24 {strides = array<i32>} : memref<16x32xf32, #tpu.memory_space<vmem>>, vector<16x32xf32>,
    return
  }
  func.func @transform_0(%arg0: i32) -> (i32, i32) {
    %c0_i32 = arith.constant 0 : i32
    %c0_i32_0 = arith.constant 0 : i32
    return %arg0, %c0_i32 : i32, i32
  }
  func.func @transform_1(%arg0: i32) -> (i32, i32) {
    %c0_i32 = arith.constant 0 : i32
    %c0_i32_0 = arith.constant 0 : i32
    return %arg0, %c0_i32 : i32, i32
  }
  func.func @transform_2(%arg0: i32) -> (i32, i32) {
    %c0_i32 = arith.constant 0 : i32
    %c0_i32_0 = arith.constant 0 : i32
    %c0_i32_1 = arith.constant 0 : i32
    return %c0_i32, %c0_i32_0 : i32, i32
  }
  func.func @transform_3(%arg0: i32) -> (i32, i32) {
    %c0_i32 = arith.constant 0 : i32
    %c0_i32_0 = arith.constant 0 : i32
    %c0_i32_1 = arith.constant 0 : i32
    return %c0_i32, %c0_i32_0 : i32, i32
  }
  func.func @transform_4(%arg0: i32) -> (i32, i32) {
    %c0_i32 = arith.constant 0 : i32
    %c0_i32_0 = arith.constant 0 : i32
    return %arg0, %c0_i32 : i32, i32
  }
}

</mosaic_0001>

<bundles_post_ra>
// kernel: tpu_custom_call.1
= control target key start
LH: loop header
LB: loop body
LE: loop exit
PB: predicated region body
PF: predicated region fallthrough
CT: control target
= control target key end

     0   :  { %9 = vsyncpa [#allocation3], 0  ;;  %s295_s0 = inlined_call_operand.hbm [shape: f32[16,32], index: 0, kind: input, shape index: {}]   ;;  %s296_s1 = inlined_call_operand.hbm [shape: f32[16,32], index: 1, kind: input, shape index: {}]   ;;  %s297_s2 = inlined_call_operand.vmem [shape: f32[1,32], index: 2, kind: input, shape index: {}]   ;;  %s298_s3 = inlined_call_operand.vmem [shape: f32[1,32], index: 3, kind: input, shape index: {}]   ;;  %s299_s4 = inlined_call_operand.hbm [shape: f32[16,32], index: 4, kind: output, shape index: {}]  }
   0x1   :  { %10 = vsyncpa [#allocation6], 0 }
   0x2   :  { %11 = vsyncpa [#allocation4], 0  ;;  %s16_s17 = sshll.u32 %s295_s0, 4  ;;  %s234_s18 = smov [#allocation2]   ;;  %s17_s17 = int_to_ptr.hbm [resolvable:$true] %s16_s17 }
   0x3   :  { %s18_s19 = sshll.u32 %s234_s18, 4  ;;  %s29_s22 = sshll.u32 %s296_s1, 4  ;;  %s19_s19 = int_to_ptr.vmem [resolvable:$true] %s18_s19  ;;  %s30_s22 = int_to_ptr.hbm [resolvable:$true] %s29_s22 }
   0x4   :  { %s235_s23 = smov 128   ;;  %s236_s24 = smov 8  }
   0x5   :  { %24 = dma.hbm_to_vmem [thread:$0]  %s17_s17, 256, %s19_s19, [#allocation3], %s235_s23, %s235_s23, %s236_s24  }
   0x6   :  { %s237_s25 = smov [#allocation5]  }
   0x7   :  { %s31_s26 = sshll.u32 %s237_s25, 4  ;;  %s32_s26 = int_to_ptr.vmem [resolvable:$true] %s31_s26 }
   0x8   :  { %37 = dma.hbm_to_vmem [thread:$0]  %s30_s22, 256, %s32_s26, [#allocation6], %s235_s23, %s235_s23, %s236_s24  }
   0x9   :  { %228 = dma.done.wait [#allocation3], 256  }
   0xa   :  { %229 = vsyncadd [#allocation3], 4294967040 }
   0xb   :  { %230 = dma.done.wait [#allocation6], 256  }
   0xc   :  { %231 = vsyncadd [#allocation6], 4294967040  ;;  %v50_v0 = vld [vmem:[#allocation2] sm:$0xff]  ;;  %v52_v1 = vld [vmem:[#allocation5] sm:$0xff]  ;;  %vm56_vm0 = vcmask 261120   ;;  %v238_v8 = vmov 32.0  }
   0xd   :  { %v54_v2 = vadd.f32 %v52_v1, %v50_v0  ;;  %v51_v3 = vld [vmem:[#allocation2 + $0x8] sm:$0xff]  ;;  %v53_v4 = vld [vmem:[#allocation5 + $0x8] sm:$0xff]  ;;  %150 = vrcp.f32 %v238_v8  ;;  %v148_v39 = vld [vmem:[%s297_s2] ss:$0 sm:$0xff]  ;;  %s239_s2 = smov [#allocation7]   ;;  %s128_s6 = sshll.u32 %s299_s4, 4  ;;  %s129_s6 = int_to_ptr.hbm [resolvable:$true] %s128_s6 }
   0xe   :  { %v55_v6 = vadd.f32 %v53_v4, %v51_v3  ;;  %v149_v43 = vld [vmem:[%s298_s3] ss:$0 sm:$0xff]  ;;  %s126_s29 = sshll.u32 %s239_s2, 4  ;;  %s127_s29 = int_to_ptr.vmem [resolvable:$true] %s126_s29 }
   0xf   :  { %v57_v5 = vsel %vm56_vm0, %v54_v2, 0.0 }
  0x10   :  { %58 = vadd.xlane.f32.xlu0 %v57_v5  ;;  %v60_v7 = vsel %vm56_vm0, %v55_v6, 0.0 }
  0x13   :  { %v151_v9 = vpop.eup %150 }
  0x14   :  { %v64_v10 = vmul.f32 32.0, %v151_v9  ;;  %vm68_vm1 = vweird.f32 %v151_v9 }
  0x16   :  { %v65_v11 = vsub.f32 1.0, %v64_v10 }
  0x18   :  { %61 = vadd.xlane.f32.xlu0 %v60_v7  ;;  %v66_v12 = vmul.f32 %v151_v9, %v65_v11 }
  0x1a   :  { %v67_v13 = vadd.f32 %v151_v9, %v66_v12 }
  0x1c   :  { %v69_v14 = vsel %vm68_vm1, %v151_v9, %v67_v13 }
  0x83   :  { %v59_v15 = vpop.xlane.xlu0 %58 }
  0x84   :  { %v70_v16 = vmul.f32 %v69_v14, %v59_v15 }
  0x86   :  { %v72_v17 = vsub.f32 %v54_v2, %v70_v16 }
  0x88   :  { %v74_v18 = vmul.f32 %v72_v17, %v72_v17 }
  0x8a   :  { %v76_v19 = vsel %vm56_vm0, %v74_v18, 0.0 }
  0x8b   :  { %77 = vadd.xlane.f32.xlu1 %v76_v19  ;;  %v62_v20 = vpop.xlane.xlu0 %61 }
  0x8c   :  { %v71_v21 = vmul.f32 %v69_v14, %v62_v20 }
  0x8e   :  { %v73_v22 = vsub.f32 %v55_v6, %v71_v21 }
  0x90   :  { %v75_v23 = vmul.f32 %v73_v22, %v73_v22 }
  0x92   :  { %v79_v24 = vsel %vm56_vm0, %v75_v23, 0.0 }
  0x93   :  { %80 = vadd.xlane.f32.xlu1 %v79_v24 }
  0xfe   :  { %v78_v25 = vpop.xlane.xlu1 %77 }
  0xff   :  { %v82_v26 = vmul.f32 %v78_v25, %v69_v14 }
 0x101   :  { %v84_v27 = vadd.f32 1e-05, %v82_v26 }
 0x103   :  { %152 = vrsqrt.f32 %v84_v27  ;;  %vm92_vm3 = vweird.f32 %v84_v27 }
 0x106   :  { %v81_v28 = vpop.xlane.xlu1 %80 }
 0x107   :  { %v83_v29 = vmul.f32 %v81_v28, %v69_v14 }
 0x109   :  { %v153_v30 = vpop.eup %152  ;;  %v85_v31 = vadd.f32 1e-05, %v83_v29 }
 0x10a   :  { %v87_v32 = vmul.f32 %v153_v30, %v84_v27  ;;  %vm93_vm2 = vweird.f32 %v153_v30 }
 0x10b   :  { %154 = vrsqrt.f32 %v85_v31  ;;  %vm94_vm4 = vmor %vm92_vm3, %vm93_vm2  ;;  %vm102_vm6 = vweird.f32 %v85_v31 }
 0x10c   :  { %v88_v33 = vmul.f32 %v153_v30, %v87_v32 }
 0x10e   :  { %v89_v34 = vmul.f32 0.5, %v88_v33 }
 0x110   :  { %v90_v35 = vsub.f32 1.5, %v89_v34 }
 0x111   :  { %v155_v36 = vpop.eup %154 }
 0x112   :  { %v91_v37 = vmul.f32 %v153_v30, %v90_v35  ;;  %v97_v38 = vmul.f32 %v155_v36, %v85_v31  ;;  %vm103_vm5 = vweird.f32 %v155_v36 }
 0x113   :  { %vm104_vm7 = vmor %vm102_vm6, %vm103_vm5 }
 0x114   :  { %v95_v40 = vsel %vm94_vm4, %v153_v30, %v91_v37  ;;  %v98_v41 = vmul.f32 %v155_v36, %v97_v38 }
 0x115   :  { %v106_v42 = vmul.f32 %v95_v40, %v72_v17 }
 0x116   :  { %v99_v44 = vmul.f32 0.5, %v98_v41 }
 0x117   :  { %v112_v45 = vmul.f32 %v148_v39, %v106_v42 }
 0x118   :  { %v100_v46 = vsub.f32 1.5, %v99_v44 }
 0x119   :  { %v118_v47 = vadd.f32 %v149_v43, %v112_v45 }
 0x11a   :  { %v101_v48 = vmul.f32 %v155_v36, %v100_v46 }
 0x11b   :  { %120 = vst.msk [vmem:[#allocation7] sm:$0xff] %vm56_vm0, %v118_v47 }
 0x11c   :  { %v105_v49 = vsel %vm104_vm7, %v155_v36, %v101_v48 }
 0x11d   :  { %v107_v50 = vmul.f32 %v105_v49, %v73_v22 }
 0x11f   :  { %v113_v51 = vmul.f32 %v148_v39, %v107_v50 }
 0x121   :  { %v119_v52 = vadd.f32 %v149_v43, %v113_v51 }
 0x123   :  { %121 = vst.msk [vmem:[#allocation7 + $0x8] sm:$0xff] %vm56_vm0, %v119_v52 }
 0x124   :  { %134 = dma.vmem_to_hbm [thread:$0]  %s127_s29, 256, %s129_s6, [#allocation4], %s235_s23, %s235_s23, %s236_s24  }
 0x125   :  { %232 = dma.done.wait [#allocation4], 256  }
 0x126   :  { %233 = vsyncadd [#allocation4], 4294967040 }
 0x127   :  { %139 = vsyncpa [#allocation3], 1 }
 0x128   :  { %140 = vsyncpa [#allocation6], 1 }
 0x129   :  { %141 = vsyncpa [#allocation4], 1 }

</bundles_post_ra>
